<compile_context>
chip_gen: v5e
topology: v5e:2x2
jax: 0.10.0
libtpu: 0.0.40
codegen_flags: <defaults>
</compile_context>

<pallas_src>
import functools

import jax
import jax.numpy as jnp
from jax import lax
from jax.experimental import pallas as pl
from jax.experimental.pallas import tpu as pltpu

raw_text = ("When forty winters shall besiege thy brow,\nAnd dig deep trenches in thy "
            "beauty's field,\nThy youth's proud livery so gazed on now,\nWill be a "
            "totter'd weed of small worth held:\nThen being asked, where all thy beauty "
            "lies,\nWhere all the treasure of thy lusty days;\nTo say, within thine own "
            "deep sunken eyes,\nWere an all-eating shame, and thriftless praise.\nHow "
            "much more praise deserv'd thy beauty's use,\nIf thou couldst answer 'This "
            "fair child of mine\nShall sum my count, and make my old excuse,'\nProving "
            "his beauty by succession thine!\nThis were to be new made when thou art "
            "old,\nAnd see thy blood warm when thou feel'st it cold.").split()

vocab = sorted(set(raw_text))          # sorted for determinism
vocab_size = len(vocab)
word_to_ix = {w: i for i, w in enumerate(vocab)}

EMBEDDING_DIM = 10
CONTEXT_SIZE = 2
HIDDEN = 128
IN_FEATURES = CONTEXT_SIZE * 2 * EMBEDDING_DIM   # 40
V_PAD = 128                                      # vocab padded to one full lane width
TILE_B = 128                                     # batch rows per grid step


def cbow_kernel(x_ref, w1_ref, b1_ref, w2_ref, b2_ref, out_ref, *, valid_v):
    # x:(TILE_B, 40)  w1:(40, 128)  b1:(1, 128)  w2:(128, 128)  b2:(1, 128)
    # out:(TILE_B, 128) -- lane-dense; only the first `valid_v` lanes are real.
    x = x_ref[...]
    h = jnp.dot(x, w1_ref[...], preferred_element_type=jnp.float32) + b1_ref[...]
    h = jnp.maximum(h, 0.0)                                           # ReLU
    logits = jnp.dot(h, w2_ref[...], preferred_element_type=jnp.float32) + b2_ref[...]

    # Mask padded vocab lanes so they don't perturb the softmax normalizer.
    lane = lax.broadcasted_iota(jnp.int32, logits.shape, 1)
    logits = jnp.where(lane < valid_v, logits, -1e30)

    # Numerically stable log-softmax along the lane axis.
    m = jnp.max(logits, axis=-1, keepdims=True)
    shifted = logits - m
    lse = jnp.log(jnp.sum(jnp.exp(shifted), axis=-1, keepdims=True))
    out_ref[...] = shifted - lse


def cbow_forward_batched(inputs, emb_table, w1, b1, w2, b2):
    """inputs: (B, 2*CONTEXT_SIZE) int32 word indices -> (B, vocab_size) log-probs."""
    B = inputs.shape[0]
    V = w2.shape[1]

    # Embedding gather + flatten: plain-JAX glue (indexing, not the hot path).
    # TODO(synk): fuse this gather into the kernel via scalar-prefetched indices.
    x = jnp.take(emb_table, inputs.reshape(-1), axis=0).reshape(B, IN_FEATURES)

    # Pad batch up to a multiple of TILE_B; pad vocab (lane) dim up to 128.
    b_pad = pl.cdiv(B, TILE_B) * TILE_B
    x = jnp.pad(x, ((0, b_pad - B), (0, 0)))
    w2p = jnp.pad(w2, ((0, 0), (0, V_PAD - V)))
    b2p = jnp.pad(b2, ((0, 0), (0, V_PAD - V)))

    out = pl.pallas_call(
        functools.partial(cbow_kernel, valid_v=V),
        out_shape=jax.ShapeDtypeStruct((b_pad, V_PAD), jnp.float32),
        grid=(b_pad // TILE_B,),
        in_specs=[
            # Activations: tiled over the batch grid axis.
            pl.BlockSpec((TILE_B, IN_FEATURES), lambda i: (i, 0)),
            # Weights/biases: same (0, 0) block every step -> VMEM-resident, DMA'd once.
            pl.BlockSpec((IN_FEATURES, HIDDEN), lambda i: (0, 0)),
            pl.BlockSpec((1, HIDDEN), lambda i: (0, 0)),
            pl.BlockSpec((HIDDEN, V_PAD), lambda i: (0, 0)),
            pl.BlockSpec((1, V_PAD), lambda i: (0, 0)),
        ],
        out_specs=pl.BlockSpec((TILE_B, V_PAD), lambda i: (i, 0)),
        compiler_params=pltpu.CompilerParams(dimension_semantics=("parallel",)),
    )(x, w1, b1, w2p, b2p)

    return out[:B, :V]


def cbow_forward(inputs, emb_table, w1, b1, w2, b2):
    """PyTorch-equivalent single-context forward: inputs (2*ctx,) -> (1, V)."""
    return cbow_forward_batched(inputs[None, :], emb_table, w1, b1, w2, b2)


def init_params(key):
    k_emb, k_w1, k_b1, k_w2, k_b2 = jax.random.split(key, 5)
    emb = jax.random.normal(k_emb, (vocab_size, EMBEDDING_DIM), jnp.float32)
    # nn.Linear init: U(-1/sqrt(fan_in), 1/sqrt(fan_in)); stored as (in, out).
    lim1 = 1.0 / jnp.sqrt(IN_FEATURES)
    w1 = jax.random.uniform(k_w1, (IN_FEATURES, HIDDEN), jnp.float32, -lim1, lim1)
    b1 = jax.random.uniform(k_b1, (1, HIDDEN), jnp.float32, -lim1, lim1)
    lim2 = 1.0 / jnp.sqrt(HIDDEN)
    w2 = jax.random.uniform(k_w2, (HIDDEN, vocab_size), jnp.float32, -lim2, lim2)
    b2 = jax.random.uniform(k_b2, (1, vocab_size), jnp.float32, -lim2, lim2)
    return emb, w1, b1, w2, b2


if __name__ == "__main__":
    key = jax.random.PRNGKey(0)
    emb, w1, b1, w2, b2 = init_params(key)

    # Build ALL CBOW contexts from the text (classic demo: 2 words before + 2 after).
    contexts = [
        [raw_text[i - 2], raw_text[i - 1], raw_text[i + 1], raw_text[i + 2]]
        for i in range(CONTEXT_SIZE, len(raw_text) - CONTEXT_SIZE)
    ]
    inputs_batch = jnp.array(
        [[word_to_ix[w] for w in ctx] for ctx in contexts], dtype=jnp.int32
    )  # (B, 4)
    B = inputs_batch.shape[0]

    log_probs = cbow_forward_batched(inputs_batch, emb, w1, b1, w2, b2)
    jax.block_until_ready(log_probs)

    # Sanity: shape and per-row probabilities summing to 1.
    assert log_probs.shape == (B, vocab_size)
    assert jnp.allclose(jnp.sum(jnp.exp(log_probs), axis=1), 1.0, atol=1e-4)

    # Cross-check against a plain-JAX reference for the whole batch.
    ref_x = jnp.take(emb, inputs_batch.reshape(-1), axis=0).reshape(B, IN_FEATURES)
    ref_h = jnp.maximum(ref_x @ w1 + b1, 0.0)
    ref = jax.nn.log_softmax(ref_h @ w2 + b2, axis=1)
    assert jnp.allclose(log_probs, ref, atol=1e-4, rtol=1e-4)

    # Single-context path (matches the PyTorch module's (1, V) output exactly).
    single = cbow_forward(inputs_batch[0], emb, w1, b1, w2, b2)
    jax.block_until_ready(single)
    assert single.shape == (1, vocab_size)
    assert jnp.allclose(single, log_probs[0:1], atol=1e-4, rtol=1e-4)

    print("KERNEL_OK")
</pallas_src>

<mosaic_0001>
module attributes {stable_mosaic.version = 11 : i64} {
  func.func @cbow_kernel(%arg0: i32, %arg1: memref<128x40xf32, #tpu.memory_space<vmem>>, %arg2: memref<40x128xf32, #tpu.memory_space<vmem>>, %arg3: memref<1x128xf32, #tpu.memory_space<vmem>>, %arg4: memref<128x128xf32, #tpu.memory_space<vmem>>, %arg5: memref<1x128xf32, #tpu.memory_space<vmem>>, %arg6: memref<128x128xf32, #tpu.memory_space<vmem>>) attributes {dimension_semantics = [#tpu.dimension_semantics<parallel>], iteration_bounds = array<i64: 1>, scalar_prefetch = 0 : i64, scratch_operands = 0 : i64, tpu.core_type = #tpu.core_type<tc>, window_params = [{transform_indices = @transform_0, window_bounds = array<i64: 128, 40>}, {pipeline_mode = #tpu.pipeline_mode<synchronous>, transform_indices = @transform_1, window_bounds = array<i64: 40, 128>}, {pipeline_mode = #tpu.pipeline_mode<synchronous>, transform_indices = @transform_2, window_bounds = array<i64: 1, 128>}, {pipeline_mode = #tpu.pipeline_mode<synchronous>, transform_indices = @transform_3, window_bounds = array<i64: 128, 128>}, {pipeline_mode = #tpu.pipeline_mode<synchronous>, transform_indices = @transform_4, window_bounds = array<i64: 1, 128>}, {transform_indices = @transform_5, window_bounds = array<i64: 128, 128>}]} {
    %c0 = arith.constant 0 : index
    %c0_0 = arith.constant 0 : index
    %0 = vector.load %arg1[%c0, %c0_0] : memref<128x40xf32, #tpu.memory_space<vmem>>, vector<128x40xf32>
    %c0_1 = arith.constant 0 : index
    %c0_2 = arith.constant 0 : index
    %1 = vector.load %arg2[%c0_1, %c0_2] : memref<40x128xf32, #tpu.memory_space<vmem>>, vector<40x128xf32>
    %cst = arith.constant dense<0.000000e+00> : vector<128x128xf32>
    %2 = tpu.matmul %0, %1, %cst {dimension_numbers = #tpu.dot_dimension_numbers<[1], [0], [0], [1], [0, 0, 1, 1], [], []>} : vector<128x40xf32>, vector<40x128xf32>, vector<128x128xf32> -> vector<128x128xf32>
    %c0_3 = arith.constant 0 : index
    %c0_4 = arith.constant 0 : index
    %3 = vector.load %arg3[%c0_3, %c0_4] : memref<1x128xf32, #tpu.memory_space<vmem>>, vector<1x128xf32>
    %4 = vector.broadcast %3 : vector<1x128xf32> to vector<128x128xf32>
    %5 = arith.addf %2, %4 : vector<128x128xf32>
    %cst_5 = arith.constant 0.000000e+00 : f32
    %6 = vector.broadcast %cst_5 : f32 to vector<128x128xf32>
    %7 = arith.maximumf %5, %6 : vector<128x128xf32>
    %c0_6 = arith.constant 0 : index
    %c0_7 = arith.constant 0 : index
    %8 = vector.load %arg4[%c0_6, %c0_7] : memref<128x128xf32, #tpu.memory_space<vmem>>, vector<128x128xf32>
    %cst_8 = arith.constant dense<0.000000e+00> : vector<128x128xf32>
    %9 = tpu.matmul %7, %8, %cst_8 {dimension_numbers = #tpu.dot_dimension_numbers<[1], [0], [0], [1], [0, 0, 1, 1], [], []>} : vector<128x128xf32>, vector<128x128xf32>, vector<128x128xf32> -> vector<128x128xf32>
    %c0_9 = arith.constant 0 : index
    %c0_10 = arith.constant 0 : index
    %10 = vector.load %arg5[%c0_9, %c0_10] : memref<1x128xf32, #tpu.memory_space<vmem>>, vector<1x128xf32>
    %11 = vector.broadcast %10 : vector<1x128xf32> to vector<128x128xf32>
    %12 = arith.addf %9, %11 : vector<128x128xf32>
    %13 = tpu.iota {dimensions = array<i32: 1>} : vector<128x128xi32>
    %c97_i32 = arith.constant 97 : i32
    %14 = vector.broadcast %c97_i32 : i32 to vector<128x128xi32>
    %15 = arith.cmpi slt, %13, %14 : vector<128x128xi32>
    %cst_11 = arith.constant -1.000000e+30 : f32
    %16 = vector.broadcast %cst_11 : f32 to vector<128x128xf32>
    %17 = arith.select %15, %12, %16 : vector<128x128xi1>, vector<128x128xf32>
    %cst_12 = arith.constant dense<0xFF800000> : vector<128xf32>
    %18 = vector.multi_reduction <maximumf>, %17, %cst_12 [1] : vector<128x128xf32> to vector<128xf32>
    %19 = vector.shape_cast %18 : vector<128xf32> to vector<128x1xf32>
    %20 = vector.broadcast %19 : vector<128x1xf32> to vector<128x128xf32>
    %21 = arith.subf %17, %20 : vector<128x128xf32>
    %22 = math.exp %21 : vector<128x128xf32>
    %cst_13 = arith.constant dense<0.000000e+00> : vector<128xf32>
    %23 = vector.multi_reduction <add>, %22, %cst_13 [1] : vector<128x128xf32> to vector<128xf32>
    %24 = vector.shape_cast %23 : vector<128xf32> to vector<128x1xf32>
    %25 = math.log %24 : vector<128x1xf32>
    %26 = vector.broadcast %25 : vector<128x1xf32> to vector<128x128xf32>
    %27 = arith.subf %21, %26 : vector<128x128xf32>
    %c0_14 = arith.constant 0 : index
    %c0_15 = arith.constant 0 : index
    %28 = vector.load %arg6[%c0_14, %c0_15] : memref<128x128xf32, #tpu.memory_space<vmem>>, vector<128x128xf32>
    tpu.vector_store %arg6[%c0_14, %c0_15], %27 {strides = array<i32>} : memref<128x128xf32, #tpu.memory_space<vmem>>, vector<128x128xf32>,
    return
  }
  func.func @transform_0(%arg0: i32) -> (i32, i32) {
    %c0_i32 = arith.constant 0 : i32
    %c0_i32_0 = arith.constant 0 : i32
    return %arg0, %c0_i32 : i32, i32
  }
  func.func @transform_1(%arg0: i32) -> (i32, i32) {
    %c0_i32 = arith.constant 0 : i32
    %c0_i32_0 = arith.constant 0 : i32
    %c0_i32_1 = arith.constant 0 : i32
    return %c0_i32, %c0_i32_0 : i32, i32
  }
  func.func @transform_2(%arg0: i32) -> (i32, i32) {
    %c0_i32 = arith.constant 0 : i32
    %c0_i32_0 = arith.constant 0 : i32
    %c0_i32_1 = arith.constant 0 : i32
    return %c0_i32, %c0_i32_0 : i32, i32
  }
  func.func @transform_3(%arg0: i32) -> (i32, i32) {
    %c0_i32 = arith.constant 0 : i32
    %c0_i32_0 = arith.constant 0 : i32
    %c0_i32_1 = arith.constant 0 : i32
    return %c0_i32, %c0_i32_0 : i32, i32
  }
  func.func @transform_4(%arg0: i32) -> (i32, i32) {
    %c0_i32 = arith.constant 0 : i32
    %c0_i32_0 = arith.constant 0 : i32
    %c0_i32_1 = arith.constant 0 : i32
    return %c0_i32, %c0_i32_0 : i32, i32
  }
  func.func @transform_5(%arg0: i32) -> (i32, i32) {
    %c0_i32 = arith.constant 0 : i32
    %c0_i32_0 = arith.constant 0 : i32
    return %arg0, %c0_i32 : i32, i32
  }
}

</mosaic_0001>

<bundles_post_ra>
// kernel: tpu_custom_call.1
= control target key start
LH: loop header
LB: loop body
LE: loop exit
PB: predicated region body
PF: predicated region fallthrough
CT: control target
= control target key end

     0   :  { %s954_s0 = inlined_call_operand.vmem [shape: f32[128,40], index: 0, kind: input, shape index: {}]   ;;  %s955_s1 = inlined_call_operand.vmem [shape: f32[40,128], index: 1, kind: input, shape index: {}]   ;;  %s956_s2 = inlined_call_operand.vmem [shape: f32[1,128], index: 2, kind: input, shape index: {}]   ;;  %s957_s3 = inlined_call_operand.vmem [shape: f32[128,128], index: 3, kind: input, shape index: {}]   ;;  %s958_s4 = inlined_call_operand.vmem [shape: f32[1,128], index: 4, kind: input, shape index: {}]   ;;  %s959_s5 = inlined_call_operand.hbm [shape: f32[128,128], index: 5, kind: output, shape index: {}]  }
   0x1   :  { %v41_v0 = vld [vmem:[%s955_s1 + $0x20] sm:$0xff]  ;;  %v40_v1 = vld [vmem:[%s955_s1 + $0x18] sm:$0xff]  ;;  %v39_v2 = vld [vmem:[%s955_s1 + $0x10] sm:$0xff] }
   0x2   :  { %106 = vmatpush.msra.mxu0 %v41_v0  ;;  %490 = vmatpush.msra.mxu3 %v41_v0  ;;  %v38_v3 = vld [vmem:[%s955_s1 + $0x8] sm:$0xff] }
   0x4   :  { %107 = vmatpush.msra.mxu0 %v40_v1  ;;  %491 = vmatpush.msra.mxu3 %v40_v1 }
   0x5   :  { %10 = vsyncpa [#allocation3], 0  ;;  %v37_v4 = vld [vmem:[%s955_s1] sm:$0xff]  ;;  %vm46_vm0 = vcmask 326656   ;;  %v22_v6 = vld [vmem:[%s954_s0 + $0x8] sm:$0xff]  ;;  %s462_s18 = sshll.u32 %s959_s5, 4  ;;  %s463_s18 = int_to_ptr.hbm [resolvable:$true] %s462_s18 }
   0x6   :  { %108 = vmatpush.msra.mxu0 %v39_v2  ;;  %492 = vmatpush.msra.mxu3 %v39_v2  ;;  %v21_v5 = vld [vmem:[%s954_s0] sm:$0xff]  ;;  %v23_v7 = vld [vmem:[%s954_s0 + $0x10] sm:$0xff]  ;;  %v24_v8 = vld [vmem:[%s954_s0 + $0x18] sm:$0xff]  ;;  %s623_s19 = smov 128   ;;  %s624_s20 = smov 8  }
   0x7   :  { %v31_v9 = vld [vmem:[%s954_s0 + $0x50] sm:$0xff]  ;;  %v25_v10 = vld [vmem:[%s954_s0 + $0x20] sm:$0xff]  ;;  %v32_v11 = vld [vmem:[%s954_s0 + $0x58] sm:$0xff] }
   0x8   :  { %109 = vmatpush.msra.mxu0 %v38_v3  ;;  %493 = vmatpush.msra.mxu3 %v38_v3  ;;  %v26_v12 = vld [vmem:[%s954_s0 + $0x28] sm:$0xff]  ;;  %v33_v13 = vld [vmem:[%s954_s0 + $0x60] sm:$0xff]  ;;  %v191_v14 = vld [vmem:[%s957_s3 + $0x78] sm:$0xff] }
   0x9   :  { %v190_v15 = vld [vmem:[%s957_s3 + $0x70] sm:$0xff]  ;;  %196 = vmatpush.msra.mxu1 %v191_v14  ;;  %495 = vmatpush.msra.mxu2 %v191_v14  ;;  %v189_v16 = vld [vmem:[%s957_s3 + $0x68] sm:$0xff]  ;;  %v188_v18 = vld [vmem:[%s957_s3 + $0x60] sm:$0xff] }
   0xa   :  { %110 = vmatpush.msra.mxu0 %v37_v4  ;;  %494 = vmatpush.msra.mxu3 %v37_v4  ;;  %v27_v17 = vld [vmem:[%s954_s0 + $0x30] sm:$0xff]  ;;  %v34_v19 = vld [vmem:[%s954_s0 + $0x68] sm:$0xff]  ;;  %v187_v20 = vld [vmem:[%s957_s3 + $0x58] sm:$0xff] }
   0xb   :  { %474 = vmatmul.msk.f32.vlgmr.msra.gmra.mxu0 %vm46_vm0, %v21_v5  ;;  %484 = vmatmul.msk.f32.vlgmr.msra.gmra.mxu3 %vm46_vm0, %v31_v9  ;;  %v186_v21 = vld [vmem:[%s957_s3 + $0x50] sm:$0xff]  ;;  %v185_v22 = vld [vmem:[%s957_s3 + $0x48] sm:$0xff]  ;;  %v28_v23 = vld [vmem:[%s954_s0 + $0x38] sm:$0xff] }
   0xc   :  { %496 = vmatpush.msrb.mxu3 %v191_v14  ;;  %197 = vmatpush.msra.mxu1 %v190_v15  ;;  %v184_v24 = vld [vmem:[%s957_s3 + $0x40] sm:$0xff]  ;;  %v35_v25 = vld [vmem:[%s954_s0 + $0x70] sm:$0xff]  ;;  %v183_v26 = vld [vmem:[%s957_s3 + $0x38] sm:$0xff] }
   0xd   :  { %497 = vmatpush.msra.mxu2 %v190_v15  ;;  %v182_v27 = vld [vmem:[%s957_s3 + $0x30] sm:$0xff]  ;;  %v181_v28 = vld [vmem:[%s957_s3 + $0x28] sm:$0xff]  ;;  %v29_v29 = vld [vmem:[%s954_s0 + $0x40] sm:$0xff] }
   0xe   :  { %498 = vmatpush.msrb.mxu3 %v190_v15  ;;  %198 = vmatpush.msra.mxu1 %v189_v16  ;;  %v180_v30 = vld [vmem:[%s957_s3 + $0x20] sm:$0xff]  ;;  %v36_v31 = vld [vmem:[%s954_s0 + $0x78] sm:$0xff]  ;;  %v30_v33 = vld [vmem:[%s954_s0 + $0x48] sm:$0xff] }
   0xf   :  { %499 = vmatpush.msra.mxu2 %v189_v16  ;;  %v179_v32 = vld [vmem:[%s957_s3 + $0x18] sm:$0xff]  ;;  %v178_v34 = vld [vmem:[%s957_s3 + $0x10] sm:$0xff]  ;;  %v177_v35 = vld [vmem:[%s957_s3 + $0x8] sm:$0xff] }
  0x10   :  { %500 = vmatpush.msrb.mxu3 %v189_v16  ;;  %199 = vmatpush.msra.mxu1 %v188_v18  ;;  %v176_v36 = vld [vmem:[%s957_s3] sm:$0xff] }
  0x11   :  { %501 = vmatpush.msra.mxu2 %v188_v18  ;;  %v530_v37 = vld [vmem:[%s956_s2] ss:$0 sm:$0xff] }
  0x12   :  { %200 = vmatpush.msra.mxu1 %v187_v20  ;;  %502 = vmatpush.msrb.mxu3 %v188_v18 }
  0x13   :  { %475 = vmatmul.msk.f32.gmra.mxu0 %vm46_vm0, %v22_v6  ;;  %485 = vmatmul.msk.f32.gmra.mxu3 %vm46_vm0, %v32_v11 }
  0x14   :  { %503 = vmatpush.msra.mxu2 %v187_v20  ;;  %201 = vmatpush.msra.mxu1 %v186_v21 }
  0x15   :  { %504 = vmatpush.msrb.mxu3 %v187_v20 }
  0x16   :  { %505 = vmatpush.msra.mxu2 %v186_v21  ;;  %202 = vmatpush.msra.mxu1 %v185_v22 }
  0x17   :  { %506 = vmatpush.msrb.mxu3 %v186_v21 }
  0x18   :  { %507 = vmatpush.msra.mxu2 %v185_v22  ;;  %203 = vmatpush.msra.mxu1 %v184_v24 }
  0x19   :  { %508 = vmatpush.msrb.mxu3 %v185_v22  ;;  %v261_v22 = vlaneseq }
  0x1a   :  { %509 = vmatpush.msra.mxu2 %v184_v24  ;;  %204 = vmatpush.msra.mxu1 %v183_v26 }
  0x1b   :  { %476 = vmatmul.msk.f32.gmra.mxu0 %vm46_vm0, %v23_v7  ;;  %486 = vmatmul.msk.f32.gmra.mxu3 %vm46_vm0, %v33_v13 }
  0x1c   :  { %511 = vmatpush.msra.mxu2 %v183_v26  ;;  %205 = vmatpush.msra.mxu1 %v182_v27 }
  0x1d   :  { %510 = vmatpush.msrb.mxu3 %v184_v24  ;;  %v531_v24 = vld [vmem:[%s958_s4] ss:$0 sm:$0xff]  ;;  %s622_s4 = smov [#allocation2]  }
  0x1e   :  { %513 = vmatpush.msra.mxu2 %v182_v27  ;;  %206 = vmatpush.msra.mxu1 %v181_v28  ;;  %s460_s15 = sshll.u32 %s622_s4, 4  ;;  %s461_s15 = int_to_ptr.vmem [resolvable:$true] %s460_s15 }
  0x1f   :  { %512 = vmatpush.msrb.mxu3 %v183_v26 }
  0x20   :  { %515 = vmatpush.msra.mxu2 %v181_v28  ;;  %207 = vmatpush.msra.mxu1 %v180_v30 }
  0x21   :  { %514 = vmatpush.msrb.mxu3 %v182_v27 }
  0x22   :  { %517 = vmatpush.msra.mxu2 %v180_v30  ;;  %208 = vmatpush.msra.mxu1 %v179_v32 }
  0x23   :  { %477 = vmatmul.msk.f32.gmra.mxu0 %vm46_vm0, %v24_v8  ;;  %487 = vmatmul.msk.f32.gmra.mxu3 %vm46_vm0, %v34_v19 }
  0x24   :  { %519 = vmatpush.msra.mxu2 %v179_v32  ;;  %516 = vmatpush.msrb.mxu3 %v181_v28 }
  0x25   :  { %209 = vmatpush.msra.mxu1 %v178_v34 }
  0x26   :  { %518 = vmatpush.msrb.mxu3 %v180_v30  ;;  %521 = vmatpush.msra.mxu2 %v178_v34 }
  0x27   :  { %210 = vmatpush.msra.mxu1 %v177_v35 }
  0x28   :  { %520 = vmatpush.msrb.mxu3 %v179_v32  ;;  %523 = vmatpush.msra.mxu2 %v177_v35 }
  0x29   :  { %211 = vmatpush.msra.mxu1 %v176_v36 }
  0x2a   :  { %522 = vmatpush.msrb.mxu3 %v178_v34  ;;  %525 = vmatpush.msra.mxu2 %v176_v36 }
  0x2b   :  { %478 = vmatmul.msk.f32.gmra.mxu0 %vm46_vm0, %v25_v10  ;;  %488 = vmatmul.msk.f32.gmra.mxu3 %vm46_vm0, %v35_v25 }
  0x2c   :  { %524 = vmatpush.msrb.mxu3 %v177_v35 }
  0x2e   :  { %526 = vmatpush.msrb.mxu3 %v176_v36 }
  0x33   :  { %479 = vmatmul.msk.f32.gmra.mxu0 %vm46_vm0, %v26_v12  ;;  %489 = vmatmul.msk.f32.gmra.mxu3 %vm46_vm0, %v36_v31 }
  0x3b   :  { %480 = vmatmul.msk.f32.gmra.mxu0 %vm46_vm0, %v27_v17 }
  0x43   :  { %481 = vmatmul.msk.f32.gmra.mxu0 %vm46_vm0, %v28_v23  ;;  %v785_v23 = vand.u32 127, %v261_v22 }
  0x45   :  { %vm263_vm1 = vcmp.lt.s32.totalorder %v785_v23, 97 }
  0x4b   :  { %482 = vmatmul.msk.f32.gmra.mxu0 %vm46_vm0, %v29_v29 }
  0x53   :  { %483 = vmatmul.msk.f32.gmra.mxu0 %vm46_vm0, %v30_v33 }
  0x88   :  { %v112_v38 = vpop.f32.mrf.mxu0 }
  0x89   :  { %v113_v39 = vadd.f32 %v530_v37, %v112_v38 }
  0x8b   :  { %v160_v40 = vmax.f32 %v113_v39, 0.0 }
  0x8d   :  { %212 = vmatmul.f32.vlgmr.msra.gmra.mxu1 %v160_v40 }
  0x8e   :  { %v142_v51 = vpop.f32.mrf.mxu3 }
  0x8f   :  { %v143_v14 = vadd.f32 %v530_v37, %v142_v51 }
  0x90   :  { %v115_v41 = vpop.f32.mrf.mxu0 }
  0x91   :  { %v116_v42 = vadd.f32 %v530_v37, %v115_v41  ;;  %v170_v15 = vmax.f32 %v143_v14, 0.0 }
  0x93   :  { %v161_v43 = vmax.f32 %v116_v42, 0.0 }
  0x95   :  { %215 = vmatmul.f32.gmra.mxu1 %v161_v43 }
  0x96   :  { %v145_v55 = vpop.f32.mrf.mxu3 }
  0x97   :  { %v146_v16 = vadd.f32 %v530_v37, %v145_v55 }
  0x98   :  { %v118_v44 = vpop.f32.mrf.mxu0 }
  0x99   :  { %v119_v45 = vadd.f32 %v530_v37, %v118_v44  ;;  %v171_v17 = vmax.f32 %v146_v16, 0.0 }
  0x9b   :  { %v162_v46 = vmax.f32 %v119_v45, 0.0 }
  0x9d   :  { %218 = vmatmul.f32.gmra.mxu1 %v162_v46 }
  0x9e   :  { %v148_v59 = vpop.f32.mrf.mxu3 }
  0x9f   :  { %v149_v18 = vadd.f32 %v530_v37, %v148_v59 }
  0xa0   :  { %v121_v47 = vpop.f32.mrf.mxu0 }
  0xa1   :  { %v122_v48 = vadd.f32 %v530_v37, %v121_v47  ;;  %v172_v19 = vmax.f32 %v149_v18, 0.0 }
  0xa3   :  { %v163_v49 = vmax.f32 %v122_v48, 0.0 }
  0xa5   :  { %221 = vmatmul.f32.gmra.mxu1 %v163_v49 }
  0xa6   :  { %v151_v63 = vpop.f32.mrf.mxu3 }
  0xa7   :  { %v152_v20 = vadd.f32 %v530_v37, %v151_v63 }
  0xa8   :  { %v124_v50 = vpop.f32.mrf.mxu0 }
  0xa9   :  { %v125_v52 = vadd.f32 %v530_v37, %v124_v50  ;;  %v173_v21 = vmax.f32 %v152_v20, 0.0 }
  0xab   :  { %v164_v53 = vmax.f32 %v125_v52, 0.0 }
  0xad   :  { %224 = vmatmul.f32.gmra.mxu1 %v164_v53 }
  0xae   :  { %v154_v3 = vpop.f32.mrf.mxu3 }
  0xaf   :  { %v155_v5 = vadd.f32 %v530_v37, %v154_v3 }
  0xb0   :  { %v127_v54 = vpop.f32.mrf.mxu0 }
  0xb1   :  { %v128_v56 = vadd.f32 %v530_v37, %v127_v54  ;;  %v174_v7 = vmax.f32 %v155_v5, 0.0 }
  0xb3   :  { %v165_v57 = vmax.f32 %v128_v56, 0.0  ;;  %254 = vmatmul.f32.vlgmr.msrb.gmra.mxu3 %v174_v7 }
  0xb5   :  { %227 = vmatmul.f32.gmra.mxu1 %v165_v57 }
  0xb6   :  { %v157_v9 = vpop.f32.mrf.mxu3 }
  0xb7   :  { %v158_v11 = vadd.f32 %v530_v37, %v157_v9 }
  0xb8   :  { %v130_v58 = vpop.f32.mrf.mxu0 }
  0xb9   :  { %v131_v60 = vadd.f32 %v530_v37, %v130_v58  ;;  %v175_v13 = vmax.f32 %v158_v11, 0.0 }
  0xbb   :  { %v166_v61 = vmax.f32 %v131_v60, 0.0  ;;  %257 = vmatmul.f32.gmra.mxu3 %v175_v13 }
  0xbd   :  { %230 = vmatmul.f32.gmra.mxu1 %v166_v61 }
  0xc0   :  { %v133_v62 = vpop.f32.mrf.mxu0 }
  0xc1   :  { %v134_v0 = vadd.f32 %v530_v37, %v133_v62 }
  0xc3   :  { %v167_v1 = vmax.f32 %v134_v0, 0.0 }
  0xc5   :  { %233 = vmatmul.f32.vlgmr.msra.gmra.mxu2 %v167_v1 }
  0xc8   :  { %v136_v2 = vpop.f32.mrf.mxu0 }
  0xc9   :  { %v137_v4 = vadd.f32 %v530_v37, %v136_v2 }
  0xcb   :  { %v168_v6 = vmax.f32 %v137_v4, 0.0 }
  0xcd   :  { %236 = vmatmul.f32.gmra.mxu2 %v168_v6 }
  0xd0   :  { %v139_v8 = vpop.f32.mrf.mxu0 }
  0xd1   :  { %v140_v10 = vadd.f32 %v530_v37, %v139_v8 }
  0xd3   :  { %v169_v12 = vmax.f32 %v140_v10, 0.0 }
  0xd5   :  { %239 = vmatmul.f32.gmra.mxu2 %v169_v12 }
  0xdd   :  { %242 = vmatmul.f32.gmra.mxu2 %v170_v15 }
  0xe5   :  { %245 = vmatmul.f32.gmra.mxu2 %v171_v17 }
  0xed   :  { %248 = vmatmul.f32.gmra.mxu2 %v172_v19 }
  0xf5   :  { %251 = vmatmul.f32.gmra.mxu2 %v173_v21 }
 0x10a   :  { %v213_v25 = vpop.f32.mrf.mxu1 }
 0x10b   :  { %v214_v26 = vadd.f32 %v531_v24, %v213_v25 }
 0x10d   :  { %v793_v27 = vsel %vm263_vm1, %v214_v26, -1e+30 }
 0x10e   :  { %280 = vmax.xlane.f32.xlu0 %v793_v27 }
 0x112   :  { %v216_v28 = vpop.f32.mrf.mxu1 }
 0x113   :  { %v217_v29 = vadd.f32 %v531_v24, %v216_v28 }
 0x115   :  { %v798_v30 = vsel %vm263_vm1, %v217_v29, -1e+30 }
 0x116   :  { %282 = vmax.xlane.f32.xlu0 %v798_v30 }
 0x11a   :  { %v219_v31 = vpop.f32.mrf.mxu1 }
 0x11b   :  { %v220_v32 = vadd.f32 %v531_v24, %v219_v31 }
 0x11d   :  { %v803_v33 = vsel %vm263_vm1, %v220_v32, -1e+30 }
 0x11e   :  { %284 = vmax.xlane.f32.xlu1 %v803_v33 }
 0x122   :  { %v222_v34 = vpop.f32.mrf.mxu1 }
 0x123   :  { %v223_v35 = vadd.f32 %v531_v24, %v222_v34 }
 0x125   :  { %v808_v36 = vsel %vm263_vm1, %v223_v35, -1e+30 }
 0x126   :  { %286 = vmax.xlane.f32.xlu1 %v808_v36 }
 0x12a   :  { %v225_v37 = vpop.f32.mrf.mxu1 }
 0x12b   :  { %v226_v38 = vadd.f32 %v531_v24, %v225_v37 }
 0x12d   :  { %v813_v39 = vsel %vm263_vm1, %v226_v38, -1e+30 }
 0x12e   :  { %288 = vmax.xlane.f32.xlu2 %v813_v39 }
 0x132   :  { %v228_v40 = vpop.f32.mrf.mxu1 }
 0x133   :  { %v229_v41 = vadd.f32 %v531_v24, %v228_v40 }
 0x135   :  { %v818_v42 = vsel %vm263_vm1, %v229_v41, -1e+30 }
 0x136   :  { %290 = vmax.xlane.f32.xlu2 %v818_v42  ;;  %v255_v59 = vpop.f32.mrf.mxu3 }
 0x137   :  { %v256_v62 = vadd.f32 %v531_v24, %v255_v59 }
 0x139   :  { %v853_v1 = vsel %vm263_vm1, %v256_v62, -1e+30 }
 0x13a   :  { %v231_v43 = vpop.f32.mrf.mxu1 }
 0x13b   :  { %v232_v44 = vadd.f32 %v531_v24, %v231_v43 }
 0x13d   :  { %v823_v45 = vsel %vm263_vm1, %v232_v44, -1e+30 }
 0x13e   :  { %292 = vmax.xlane.f32.xlu0 %v823_v45  ;;  %v258_v2 = vpop.f32.mrf.mxu3 }
 0x13f   :  { %v259_v4 = vadd.f32 %v531_v24, %v258_v2 }
 0x141   :  { %v863_v7 = vsel %vm263_vm1, %v259_v4, -1e+30 }
 0x148   :  { %v234_v46 = vpop.f32.mrf.mxu2 }
 0x149   :  { %v235_v47 = vadd.f32 %v531_v24, %v234_v46 }
 0x14b   :  { %v828_v48 = vsel %vm263_vm1, %v235_v47, -1e+30 }
 0x14c   :  { %294 = vmax.xlane.f32.xlu1 %v828_v48 }
 0x150   :  { %v237_v49 = vpop.f32.mrf.mxu2 }
 0x151   :  { %v238_v50 = vadd.f32 %v531_v24, %v237_v49 }
 0x153   :  { %v833_v51 = vsel %vm263_vm1, %v238_v50, -1e+30 }
 0x154   :  { %296 = vmax.xlane.f32.xlu2 %v833_v51 }
 0x158   :  { %v240_v52 = vpop.f32.mrf.mxu2 }
 0x159   :  { %v241_v53 = vadd.f32 %v531_v24, %v240_v52 }
 0x15b   :  { %v838_v54 = vsel %vm263_vm1, %v241_v53, -1e+30 }
 0x15c   :  { %298 = vmax.xlane.f32.xlu0 %v838_v54 }
 0x160   :  { %v243_v55 = vpop.f32.mrf.mxu2 }
 0x161   :  { %v244_v56 = vadd.f32 %v531_v24, %v243_v55 }
 0x163   :  { %v843_v57 = vsel %vm263_vm1, %v244_v56, -1e+30 }
 0x164   :  { %300 = vmax.xlane.f32.xlu1 %v843_v57 }
 0x168   :  { %v246_v58 = vpop.f32.mrf.mxu2 }
 0x169   :  { %v247_v60 = vadd.f32 %v531_v24, %v246_v58 }
 0x16b   :  { %v848_v61 = vsel %vm263_vm1, %v247_v60, -1e+30 }
 0x16c   :  { %302 = vmax.xlane.f32.xlu2 %v848_v61 }
 0x170   :  { %v249_v63 = vpop.f32.mrf.mxu2 }
 0x171   :  { %v250_v0 = vadd.f32 %v531_v24, %v249_v63 }
 0x173   :  { %v857_v3 = vsel %vm263_vm1, %v250_v0, -1e+30 }
 0x174   :  { %308 = vmax.xlane.f32.xlu2 %v853_v1  ;;  %304 = vmax.xlane.f32.xlu0 %v857_v3 }
 0x178   :  { %v252_v5 = vpop.f32.mrf.mxu2 }
 0x179   :  { %v253_v6 = vadd.f32 %v531_v24, %v252_v5 }
 0x17b   :  { %v867_v8 = vsel %vm263_vm1, %v253_v6, -1e+30 }
 0x17c   :  { %306 = vmax.xlane.f32.xlu1 %v867_v8  ;;  %310 = vmax.xlane.f32.xlu0 %v863_v7 }
 0x181   :  { %v281_v9 = vpop.xlane.xlu0 %280 }
 0x182   :  { %v872_v10 = vsub.f32 %v793_v27, %v281_v9 }
 0x184   :  { %v328_v11 = vmul.f32 1.442695, %v872_v10 }
 0x186   :  { %532 = vpow2.f32 %v328_v11 }
 0x189   :  { %v283_v12 = vpop.xlane.xlu0 %282 }
 0x18a   :  { %v876_v13 = vsub.f32 %v798_v30, %v283_v12 }
 0x18c   :  { %v533_v14 = vpop.eup %532  ;;  %v330_v15 = vmul.f32 1.442695, %v876_v13 }
 0x18d   :  { %360 = vadd.xlane.f32.xlu1 %v533_v14 }
 0x18e   :  { %534 = vpow2.f32 %v330_v15 }
 0x191   :  { %v285_v16 = vpop.xlane.xlu1 %284 }
 0x192   :  { %v880_v17 = vsub.f32 %v803_v33, %v285_v16 }
 0x194   :  { %v535_v18 = vpop.eup %534  ;;  %v332_v19 = vmul.f32 1.442695, %v880_v17 }
 0x195   :  { %362 = vadd.xlane.f32.xlu2 %v535_v18 }
 0x196   :  { %536 = vpow2.f32 %v332_v19 }
 0x199   :  { %v287_v20 = vpop.xlane.xlu1 %286 }
 0x19a   :  { %v884_v21 = vsub.f32 %v808_v36, %v287_v20 }
 0x19c   :  { %v537_v22 = vpop.eup %536  ;;  %v334_v23 = vmul.f32 1.442695, %v884_v21 }
 0x19d   :  { %364 = vadd.xlane.f32.xlu0 %v537_v22 }
 0x19e   :  { %538 = vpow2.f32 %v334_v23 }
 0x1a1   :  { %v289_v24 = vpop.xlane.xlu2 %288 }
 0x1a2   :  { %v888_v25 = vsub.f32 %v813_v39, %v289_v24 }
 0x1a4   :  { %v539_v26 = vpop.eup %538  ;;  %v336_v27 = vmul.f32 1.442695, %v888_v25 }
 0x1a5   :  { %366 = vadd.xlane.f32.xlu1 %v539_v26 }
 0x1a6   :  { %540 = vpow2.f32 %v336_v27 }
 0x1a9   :  { %v291_v28 = vpop.xlane.xlu2 %290 }
 0x1aa   :  { %v892_v29 = vsub.f32 %v818_v42, %v291_v28 }
 0x1ac   :  { %v541_v30 = vpop.eup %540  ;;  %v338_v31 = vmul.f32 1.442695, %v892_v29 }
 0x1ad   :  { %368 = vadd.xlane.f32.xlu2 %v541_v30 }
 0x1ae   :  { %542 = vpow2.f32 %v338_v31 }
 0x1b1   :  { %v293_v32 = vpop.xlane.xlu0 %292 }
 0x1b2   :  { %v896_v33 = vsub.f32 %v823_v45, %v293_v32 }
 0x1b4   :  { %v543_v34 = vpop.eup %542  ;;  %v340_v35 = vmul.f32 1.442695, %v896_v33 }
 0x1b5   :  { %370 = vadd.xlane.f32.xlu0 %v543_v34 }
 0x1b6   :  { %544 = vpow2.f32 %v340_v35 }
 0x1bc   :  { %v545_v36 = vpop.eup %544 }
 0x1bd   :  { %372 = vadd.xlane.f32.xlu1 %v545_v36 }
 0x1bf   :  { %v295_v37 = vpop.xlane.xlu1 %294 }
 0x1c0   :  { %v900_v38 = vsub.f32 %v828_v48, %v295_v37 }
 0x1c2   :  { %v342_v39 = vmul.f32 1.442695, %v900_v38 }
 0x1c4   :  { %546 = vpow2.f32 %v342_v39 }
 0x1c7   :  { %v297_v40 = vpop.xlane.xlu2 %296 }
 0x1c8   :  { %v904_v41 = vsub.f32 %v833_v51, %v297_v40 }
 0x1ca   :  { %v547_v42 = vpop.eup %546  ;;  %v344_v43 = vmul.f32 1.442695, %v904_v41 }
 0x1cb   :  { %374 = vadd.xlane.f32.xlu2 %v547_v42 }
 0x1cc   :  { %548 = vpow2.f32 %v344_v43 }
 0x1cf   :  { %v299_v44 = vpop.xlane.xlu0 %298 }
 0x1d0   :  { %v908_v45 = vsub.f32 %v838_v54, %v299_v44 }
 0x1d2   :  { %v549_v46 = vpop.eup %548  ;;  %v346_v47 = vmul.f32 1.442695, %v908_v45 }
 0x1d3   :  { %376 = vadd.xlane.f32.xlu0 %v549_v46 }
 0x1d4   :  { %550 = vpow2.f32 %v346_v47 }
 0x1d7   :  { %v301_v48 = vpop.xlane.xlu1 %300 }
 0x1d8   :  { %v912_v49 = vsub.f32 %v843_v57, %v301_v48 }
 0x1da   :  { %v551_v50 = vpop.eup %550  ;;  %v348_v51 = vmul.f32 1.442695, %v912_v49 }
 0x1db   :  { %378 = vadd.xlane.f32.xlu1 %v551_v50 }
 0x1dc   :  { %552 = vpow2.f32 %v348_v51 }
 0x1df   :  { %v303_v52 = vpop.xlane.xlu2 %302 }
 0x1e0   :  { %v916_v53 = vsub.f32 %v848_v61, %v303_v52 }
 0x1e2   :  { %v553_v54 = vpop.eup %552  ;;  %v350_v55 = vmul.f32 1.442695, %v916_v53 }
 0x1e3   :  { %380 = vadd.xlane.f32.xlu2 %v553_v54 }
 0x1e4   :  { %554 = vpow2.f32 %v350_v55 }
 0x1e7   :  { %v309_v56 = vpop.xlane.xlu2 %308  ;;  %v305_v58 = vpop.xlane.xlu0 %304 }
 0x1e8   :  { %v920_v59 = vsub.f32 %v853_v1, %v309_v56  ;;  %v923_v57 = vsub.f32 %v857_v3, %v305_v58 }
 0x1ea   :  { %v555_v60 = vpop.eup %554  ;;  %v356_v62 = vmul.f32 1.442695, %v920_v59  ;;  %v352_v63 = vmul.f32 1.442695, %v923_v57 }
 0x1eb   :  { %382 = vadd.xlane.f32.xlu0 %v555_v60 }
 0x1ec   :  { %556 = vpow2.f32 %v356_v62 }
 0x1ed   :  { %558 = vpow2.f32 %v352_v63 }
 0x1ef   :  { %v307_v61 = vpop.xlane.xlu1 %306  ;;  %v311_v0 = vpop.xlane.xlu0 %310 }
 0x1f0   :  { %v928_v2 = vsub.f32 %v867_v8, %v307_v61  ;;  %v931_v4 = vsub.f32 %v863_v7, %v311_v0 }
 0x1f2   :  { %v557_v1 = vpop.eup %556  ;;  %v354_v3 = vmul.f32 1.442695, %v928_v2  ;;  %v358_v5 = vmul.f32 1.442695, %v931_v4 }
 0x1f3   :  { %v559_v6 = vpop.eup %558  ;;  %388 = vadd.xlane.f32.xlu0 %v557_v1 }
 0x1f4   :  { %560 = vpow2.f32 %v354_v3  ;;  %384 = vadd.xlane.f32.xlu1 %v559_v6 }
 0x1f5   :  { %562 = vpow2.f32 %v358_v5 }
 0x1fa   :  { %v561_v9 = vpop.eup %560 }
 0x1fb   :  { %v563_v11 = vpop.eup %562  ;;  %386 = vadd.xlane.f32.xlu2 %v561_v9 }
 0x1fc   :  { %390 = vadd.xlane.f32.xlu1 %v563_v11 }
 0x200   :  { %v361_v12 = vpop.xlane.xlu1 %360 }
 0x201   :  { %564 = vlog2.f32 %v361_v12 }
 0x207   :  { %v565_v8 = vpop.eup %564 }
 0x208   :  { %v393_v14 = vmul.f32 0.6931472, %v565_v8  ;;  %v363_v7 = vpop.xlane.xlu2 %362 }
 0x209   :  { %566 = vlog2.f32 %v363_v7 }
 0x20a   :  { %v424_v15 = vsub.f32 %v872_v10, %v393_v14 }
 0x20c   :  { %440 = vst [vmem:[#allocation2] sm:$0xff] %v424_v15 }
 0x20f   :  { %v567_v16 = vpop.eup %566 }
 0x210   :  { %v395_v18 = vmul.f32 0.6931472, %v567_v16  ;;  %v365_v19 = vpop.xlane.xlu0 %364 }
 0x211   :  { %568 = vlog2.f32 %v365_v19 }
 0x212   :  { %v425_v20 = vsub.f32 %v876_v13, %v395_v18 }
 0x214   :  { %441 = vst [vmem:[#allocation2 + $0x8] sm:$0xff] %v425_v20 }
 0x217   :  { %v569_v22 = vpop.eup %568 }
 0x218   :  { %v397_v23 = vmul.f32 0.6931472, %v569_v22  ;;  %v367_v24 = vpop.xlane.xlu1 %366 }
 0x219   :  { %570 = vlog2.f32 %v367_v24 }
 0x21a   :  { %v426_v26 = vsub.f32 %v880_v17, %v397_v23 }
 0x21c   :  { %442 = vst [vmem:[#allocation2 + $0x10] sm:$0xff] %v426_v26 }
 0x21f   :  { %v571_v27 = vpop.eup %570 }
 0x220   :  { %v399_v28 = vmul.f32 0.6931472, %v571_v27  ;;  %v369_v30 = vpop.xlane.xlu2 %368 }
 0x221   :  { %572 = vlog2.f32 %v369_v30 }
 0x222   :  { %v427_v10 = vsub.f32 %v884_v21, %v399_v28 }
 0x224   :  { %443 = vst [vmem:[#allocation2 + $0x18] sm:$0xff] %v427_v10 }
 0x227   :  { %v573_v31 = vpop.eup %572 }
 0x228   :  { %v401_v32 = vmul.f32 0.6931472, %v573_v31  ;;  %v371_v34 = vpop.xlane.xlu0 %370 }
 0x229   :  { %574 = vlog2.f32 %v371_v34 }
 0x22a   :  { %v428_v13 = vsub.f32 %v888_v25, %v401_v32 }
 0x22c   :  { %444 = vst [vmem:[#allocation2 + $0x20] sm:$0xff] %v428_v13 }
 0x22f   :  { %v575_v35 = vpop.eup %574 }
 0x230   :  { %v403_v36 = vmul.f32 0.6931472, %v575_v35  ;;  %v373_v37 = vpop.xlane.xlu1 %372 }
 0x231   :  { %576 = vlog2.f32 %v373_v37 }
 0x232   :  { %v429_v17 = vsub.f32 %v892_v29, %v403_v36 }
 0x234   :  { %445 = vst [vmem:[#allocation2 + $0x28] sm:$0xff] %v429_v17 }
 0x237   :  { %v577_v39 = vpop.eup %576 }
 0x238   :  { %v405_v40 = vmul.f32 0.6931472, %v577_v39 }
 0x23a   :  { %v430_v42 = vsub.f32 %v896_v33, %v405_v40 }
 0x23c   :  { %446 = vst [vmem:[#allocation2 + $0x30] sm:$0xff] %v430_v42 }
 0x23e   :  { %v375_v21 = vpop.xlane.xlu2 %374 }
 0x23f   :  { %578 = vlog2.f32 %v375_v21 }
 0x245   :  { %v579_v43 = vpop.eup %578 }
 0x246   :  { %v407_v44 = vmul.f32 0.6931472, %v579_v43  ;;  %v377_v46 = vpop.xlane.xlu0 %376 }
 0x247   :  { %580 = vlog2.f32 %v377_v46 }
 0x248   :  { %v431_v25 = vsub.f32 %v900_v38, %v407_v44 }
 0x24a   :  { %447 = vst [vmem:[#allocation2 + $0x38] sm:$0xff] %v431_v25 }
 0x24d   :  { %v581_v47 = vpop.eup %580 }
 0x24e   :  { %v409_v48 = vmul.f32 0.6931472, %v581_v47  ;;  %v379_v50 = vpop.xlane.xlu1 %378 }
 0x24f   :  { %582 = vlog2.f32 %v379_v50 }
 0x250   :  { %v432_v29 = vsub.f32 %v904_v41, %v409_v48 }
 0x252   :  { %448 = vst [vmem:[#allocation2 + $0x40] sm:$0xff] %v432_v29 }
 0x255   :  { %v583_v51 = vpop.eup %582 }
 0x256   :  { %v411_v52 = vmul.f32 0.6931472, %v583_v51  ;;  %v381_v33 = vpop.xlane.xlu2 %380 }
 0x257   :  { %584 = vlog2.f32 %v381_v33 }
 0x258   :  { %v433_v54 = vsub.f32 %v908_v45, %v411_v52 }
 0x25a   :  { %449 = vst [vmem:[#allocation2 + $0x48] sm:$0xff] %v433_v54 }
 0x25d   :  { %v585_v55 = vpop.eup %584 }
 0x25e   :  { %v413_v56 = vmul.f32 0.6931472, %v585_v55  ;;  %v383_v58 = vpop.xlane.xlu0 %382 }
 0x25f   :  { %586 = vlog2.f32 %v383_v58 }
 0x260   :  { %v434_v38 = vsub.f32 %v912_v49, %v413_v56 }
 0x262   :  { %450 = vst [vmem:[#allocation2 + $0x50] sm:$0xff] %v434_v38 }
 0x265   :  { %v587_v60 = vpop.eup %586 }
 0x266   :  { %v415_v62 = vmul.f32 0.6931472, %v587_v60  ;;  %v389_v63 = vpop.xlane.xlu0 %388 }
 0x267   :  { %v385_v61 = vpop.xlane.xlu1 %384  ;;  %588 = vlog2.f32 %v389_v63 }
 0x268   :  { %v435_v41 = vsub.f32 %v916_v53, %v415_v62  ;;  %590 = vlog2.f32 %v385_v61 }
 0x26a   :  { %451 = vst [vmem:[#allocation2 + $0x58] sm:$0xff] %v435_v41 }
 0x26d   :  { %v589_v0 = vpop.eup %588 }
 0x26e   :  { %v591_v1 = vpop.eup %590  ;;  %v421_v45 = vmul.f32 0.6931472, %v589_v0  ;;  %v387_v3 = vpop.xlane.xlu2 %386 }
 0x26f   :  { %v417_v5 = vmul.f32 0.6931472, %v591_v1  ;;  %592 = vlog2.f32 %v387_v3  ;;  %v391_v6 = vpop.xlane.xlu1 %390 }
 0x270   :  { %v438_v9 = vsub.f32 %v920_v59, %v421_v45  ;;  %594 = vlog2.f32 %v391_v6 }
 0x271   :  { %v436_v49 = vsub.f32 %v923_v57, %v417_v5 }
 0x272   :  { %454 = vst [vmem:[#allocation2 + $0x70] sm:$0xff] %v438_v9 }
 0x273   :  { %452 = vst [vmem:[#allocation2 + $0x60] sm:$0xff] %v436_v49 }
 0x275   :  { %v593_v11 = vpop.eup %592 }
 0x276   :  { %v595_v53 = vpop.eup %594  ;;  %v419_v12 = vmul.f32 0.6931472, %v593_v11 }
 0x277   :  { %v423_v8 = vmul.f32 0.6931472, %v595_v53 }
 0x278   :  { %v437_v14 = vsub.f32 %v928_v2, %v419_v12 }
 0x279   :  { %v439_v59 = vsub.f32 %v931_v4, %v423_v8 }
 0x27a   :  { %453 = vst [vmem:[#allocation2 + $0x68] sm:$0xff] %v437_v14 }
 0x27b   :  { %455 = vst [vmem:[#allocation2 + $0x78] sm:$0xff] %v439_v59 }
 0x27c   :  { %468 = dma.vmem_to_hbm [thread:$0]  %s461_s15, 2048, %s463_s18, [#allocation3], %s623_s19, %s623_s19, %s624_s20  }
 0x27d   :  { %620 = dma.done.wait [#allocation3], 2048  }
 0x27e   :  { %621 = vsyncadd [#allocation3], 4294965248 }
 0x27f   :  { %473 = vsyncpa [#allocation3], 1 }

</bundles_post_ra>
